<compile_context>
chip_gen: v5e
topology: v5e:2x2
jax: 0.10.0
libtpu: 0.0.40
codegen_flags: <defaults>
</compile_context>

<pallas_src>
import functools
from typing import NamedTuple

import jax
import jax.numpy as jnp
from jax.experimental import pallas as pl
from jax.experimental.pallas import tpu as pltpu


def _round_up(n, m):
    return (n + m - 1) // m * m


@functools.lru_cache(maxsize=1)
def _device_budget():
    """Per-TPU-generation VMEM / tiling budgets (queried once)."""
    try:
        kind = jax.devices()[0].device_kind.lower()
    except Exception:  # pragma: no cover - defensive
        kind = ""
    if "v5" in kind or "v6" in kind:
        # 128 MiB physical VMEM: raise the scoped limit, use bigger batch tiles.
        return {"vmem_limit": 100 << 20, "weight_budget": 72 << 20, "tm_target": 512}
    # v7x has only 64 MiB physical VMEM per TensorCore; also the safe default.
    return {"vmem_limit": 48 << 20, "weight_budget": 32 << 20, "tm_target": 256}


class MLPConfig(NamedTuple):
    out_dim: int      # true (unpadded) output dim, for the final column slice
    tk: int           # K-tile over in_dim; 0 => weights fully VMEM-resident
    tm_target: int    # target batch-tile rows
    vmem_limit: int   # scoped VMEM limit passed to Mosaic


# --------------------------------------------------------------------------------------
# Kernels
# --------------------------------------------------------------------------------------
def _mlp_kernel(x_ref, w1_ref, b1_ref, w2_ref, b2_ref, o_ref):
    """Weights fully VMEM-resident: two MXU matmuls + bias/ReLU, one batch tile."""
    h = jnp.dot(x_ref[...], w1_ref[...], preferred_element_type=jnp.float32)
    # bias-add + ReLU in f32, then immediately narrow to the compute dtype so the
    # (tm, 1024) intermediate is 2 bytes/elem if it spills to VMEM.
    h = jnp.maximum(h + b1_ref[...], 0.0).astype(w2_ref.dtype)
    y = jnp.dot(h, w2_ref[...], preferred_element_type=jnp.float32) + b2_ref[...]
    o_ref[...] = y.astype(o_ref.dtype)


def _mlp_kernel_ktiled(x_ref, w1_ref, b1_ref, w2_ref, b2_ref, o_ref, h_acc):
    """Fallback when w1 is too large to keep resident: accumulate matmul 1 over K
    tiles of in_dim, finalize (bias + ReLU + matmul 2) on the last K step."""
    k = pl.program_id(1)

    @pl.when(k == 0)
    def _():
        h_acc[...] = jnp.zeros_like(h_acc)

    h_acc[...] += jnp.dot(x_ref[...], w1_ref[...], preferred_element_type=jnp.float32)

    @pl.when(k == pl.num_programs(1) - 1)
    def _():
        h = jnp.maximum(h_acc[...] + b1_ref[...], 0.0).astype(w2_ref.dtype)
        y = jnp.dot(h, w2_ref[...], preferred_element_type=jnp.float32) + b2_ref[...]
        o_ref[...] = y.astype(o_ref.dtype)


# --------------------------------------------------------------------------------------
# One-time parameter preparation (pad + cast ONCE, not per forward call)
# --------------------------------------------------------------------------------------
def prepare_mlp_params(w1, b1, w2, b2, *, compute_dtype=jnp.bfloat16,
                       tm_target=None, force_tk=None):
    """Pad + cast the Linear parameters once and pick a kernel configuration.

    w1: (in_dim, hidden), b1: (hidden,) or (1, hidden),
    w2: (hidden, out_dim), b2: (out_dim,) or (1, out_dim).

    Matmul operands are cast to `compute_dtype` (bf16 default: ~1e-2 relative error
    vs. an f32 PyTorch MLP; pass compute_dtype=jnp.float32 for full f32 fidelity).
    Returns ((w1p, b1p, w2p, b2p), cfg) — reuse these across forward calls.
    """
    in_dim, hidden = w1.shape
    out_dim = w2.shape[1]
    hid_pad = _round_up(hidden, 128)    # 1000 -> 1024: clean MXU / lane tiling
    out_pad = _round_up(out_dim, 128)   # lane-dense (unmasked) output stores

    budget = _device_budget()
    if tm_target is None:
        tm_target = budget["tm_target"]
    itemsize = jnp.dtype(compute_dtype).itemsize

    # Resident weights are double-buffered by the pipeline -> 2x in the estimate.
    resident_bytes = 2 * itemsize * (in_dim * hid_pad + hid_pad * out_pad)
    if force_tk is not None:
        tk = int(force_tk)
    elif resident_bytes > budget["weight_budget"]:
        tk = 512                       # K-tile matmul 1 instead of keeping w1 resident
    else:
        tk = 0                         # weights fully VMEM-resident
    if tk:
        assert tk % 128 == 0
        in_pad = _round_up(in_dim, tk)
    else:
        in_pad = in_dim
    # TODO(synk): if hid_pad*out_pad alone still exceeds the budget (huge out_dim),
    #             an additional N-tiling of the second matmul would be required.

    w1p = jnp.zeros((in_pad, hid_pad), compute_dtype).at[:in_dim, :hidden].set(
        w1.astype(compute_dtype))
    b1p = jnp.zeros((1, hid_pad), jnp.float32).at[:, :hidden].set(
        b1.astype(jnp.float32).reshape(1, hidden))
    w2p = jnp.zeros((hid_pad, out_pad), compute_dtype).at[:hidden, :out_dim].set(
        w2.astype(compute_dtype))
    b2p = jnp.zeros((1, out_pad), jnp.float32).at[:, :out_dim].set(
        b2.astype(jnp.float32).reshape(1, out_dim))

    cfg = MLPConfig(out_dim=out_dim, tk=tk, tm_target=int(tm_target),
                    vmem_limit=int(budget["vmem_limit"]))
    return (w1p, b1p, w2p, b2p), cfg


# --------------------------------------------------------------------------------------
# Forward
# --------------------------------------------------------------------------------------
@functools.partial(jax.jit, static_argnames=("cfg",))
def mlp_forward(x, w1p, b1p, w2p, b2p, *, cfg: MLPConfig):
    """x: (B, in_dim); pre-padded params from prepare_mlp_params.
    Returns (B, out_dim) in x.dtype."""
    B, in_dim = x.shape
    in_pad, hid_pad = w1p.shape
    out_pad = w2p.shape[1]
    compute_dtype = w1p.dtype
    out_dtype = x.dtype

    # ---- batch tiling ----------------------------------------------------------------
    sub = 16 if jnp.dtype(compute_dtype).itemsize == 2 else 8  # bf16 packs 16 sublanes
    if B < sub:
        Bp = sub                      # tiny batch: pad a few rows (cheap, keeps blocks legal)
        tm = sub
    else:
        Bp = B                        # no host-side batch padding; Pallas handles the
        tm = min(cfg.tm_target, (B // sub) * sub)   # partial last tile, wrapper slices [:B]
        if pl.cdiv(B, tm) < 2:
            # >= 2 batch tiles so both v7x TensorCores get work on the "parallel" axis.
            tm = min((B // sub) * sub, max(sub, _round_up(pl.cdiv(B, 2), sub)))
    num_bt = pl.cdiv(Bp, tm)

    xc = x.astype(compute_dtype)
    if Bp != B or in_pad != in_dim:
        xc = jnp.pad(xc, ((0, Bp - B), (0, in_pad - in_dim)))

    if cfg.tk == 0:
        # Weights fully VMEM-resident (constant index_maps -> DMA'd once), batch-tiled grid.
        out = pl.pallas_call(
            _mlp_kernel,
            out_shape=jax.ShapeDtypeStruct((Bp, out_pad), out_dtype),
            grid=(num_bt,),
            in_specs=[
                pl.BlockSpec((tm, in_pad), lambda i: (i, 0)),        # batch-tiled activations
                pl.BlockSpec((in_pad, hid_pad), lambda i: (0, 0)),   # grid-invariant weights
                pl.BlockSpec((1, hid_pad), lambda i: (0, 0)),
                pl.BlockSpec((hid_pad, out_pad), lambda i: (0, 0)),
                pl.BlockSpec((1, out_pad), lambda i: (0, 0)),
            ],
            out_specs=pl.BlockSpec((tm, out_pad), lambda i: (i, 0)),
            compiler_params=pltpu.CompilerParams(
                dimension_semantics=("parallel",),
                vmem_limit_bytes=cfg.vmem_limit,
            ),
        )(xc, w1p, b1p, w2p, b2p)
    else:
        # K-tiled fallback: matmul 1 accumulated over in_dim tiles; reduction axis last.
        tk = cfg.tk
        nk = in_pad // tk
        out = pl.pallas_call(
            _mlp_kernel_ktiled,
            out_shape=jax.ShapeDtypeStruct((Bp, out_pad), out_dtype),
            grid=(num_bt, nk),
            in_specs=[
                pl.BlockSpec((tm, tk), lambda i, k: (i, k)),
                pl.BlockSpec((tk, hid_pad), lambda i, k: (k, 0)),
                pl.BlockSpec((1, hid_pad), lambda i, k: (0, 0)),
                pl.BlockSpec((hid_pad, out_pad), lambda i, k: (0, 0)),
                pl.BlockSpec((1, out_pad), lambda i, k: (0, 0)),
            ],
            out_specs=pl.BlockSpec((tm, out_pad), lambda i, k: (i, 0)),
            scratch_shapes=[pltpu.VMEM((tm, hid_pad), jnp.float32)],
            compiler_params=pltpu.CompilerParams(
                dimension_semantics=("parallel", "arbitrary"),
                vmem_limit_bytes=cfg.vmem_limit,
            ),
        )(xc, w1p, b1p, w2p, b2p)

    return out[:B, :cfg.out_dim]


def init_mlp_params(key, input_dim, output_dim, hidden=1000, dtype=jnp.float32):
    """Deterministic synthetic init (uniform, like PyTorch's default Linear init)."""
    k1, k2, k3, k4 = jax.random.split(key, 4)
    bound1 = 1.0 / (input_dim ** 0.5)
    bound2 = 1.0 / (hidden ** 0.5)
    w1 = jax.random.uniform(k1, (input_dim, hidden), dtype, -bound1, bound1)
    b1 = jax.random.uniform(k2, (1, hidden), dtype, -bound1, bound1)
    w2 = jax.random.uniform(k3, (hidden, output_dim), dtype, -bound2, bound2)
    b2 = jax.random.uniform(k4, (1, output_dim), dtype, -bound2, bound2)
    return w1, b1, w2, b2


if __name__ == "__main__":
    key = jax.random.PRNGKey(0)

    # Small shapes consistent with the module (MLP(input_dim=32, output_dim=10)).
    batch, input_dim, output_dim = 2, 32, 10
    kx, kp = jax.random.split(key)
    x = jax.random.normal(kx, (batch, input_dim), jnp.float32)
    w1, b1, w2, b2 = init_mlp_params(kp, input_dim, output_dim)

    # (1) Default bf16-operand path, weights fully VMEM-resident.
    params, cfg = prepare_mlp_params(w1, b1, w2, b2)
    out = jax.block_until_ready(mlp_forward(x, *params, cfg=cfg))
    assert out.shape == (batch, output_dim)
    assert out.dtype == x.dtype

    xb, w1b, w2b = (a.astype(jnp.bfloat16) for a in (x, w1, w2))
    h_ref = jnp.maximum(jnp.dot(xb, w1b, preferred_element_type=jnp.float32) + b1, 0.0)
    ref = jnp.dot(h_ref.astype(jnp.bfloat16), w2b, preferred_element_type=jnp.float32) + b2
    assert jnp.allclose(out, ref, atol=1e-4, rtol=1e-4)

    # (2) Full-f32 operand path (fidelity option; loose tolerance since MXU f32
    #     pass decomposition may differ from XLA's reference matmul precision).
    params32, cfg32 = prepare_mlp_params(w1, b1, w2, b2, compute_dtype=jnp.float32)
    out32 = jax.block_until_ready(mlp_forward(x, *params32, cfg=cfg32))
    ref32 = jnp.maximum(x @ w1 + b1, 0.0) @ w2 + b2
    assert jnp.allclose(out32, ref32, atol=1e-2, rtol=1e-2)

    # (3) K-tiled fallback (auto-selected for large weights); force it at a small
    #     shape here to exercise the code path.
    batch2, input_dim2 = 4, 256
    kx2, kp2 = jax.random.split(jax.random.PRNGKey(1))
    x2 = jax.random.normal(kx2, (batch2, input_dim2), jnp.float32)
    w1k, b1k, w2k, b2k = init_mlp_params(kp2, input_dim2, output_dim)
    paramsk, cfgk = prepare_mlp_params(w1k, b1k, w2k, b2k, force_tk=128)
    outk = jax.block_until_ready(mlp_forward(x2, *paramsk, cfg=cfgk))
    hk = jnp.maximum(jnp.dot(x2.astype(jnp.bfloat16), w1k.astype(jnp.bfloat16),
                             preferred_element_type=jnp.float32) + b1k, 0.0)
    refk = jnp.dot(hk.astype(jnp.bfloat16), w2k.astype(jnp.bfloat16),
                   preferred_element_type=jnp.float32) + b2k
    assert outk.shape == (batch2, output_dim)
    assert jnp.allclose(outk, refk, atol=2e-3, rtol=2e-3)

    print("KERNEL_OK")
</pallas_src>

<mosaic_0001>
module attributes {stable_mosaic.version = 11 : i64} {
  func.func @_mlp_kernel(%arg0: i32, %arg1: memref<16x32xbf16, #tpu.memory_space<vmem>>, %arg2: memref<32x1024xbf16, #tpu.memory_space<vmem>>, %arg3: memref<1x1024xf32, #tpu.memory_space<vmem>>, %arg4: memref<1024x128xbf16, #tpu.memory_space<vmem>>, %arg5: memref<1x128xf32, #tpu.memory_space<vmem>>, %arg6: memref<16x128xf32, #tpu.memory_space<vmem>>) attributes {dimension_semantics = [#tpu.dimension_semantics<parallel>], iteration_bounds = array<i64: 1>, scalar_prefetch = 0 : i64, scratch_operands = 0 : i64, tpu.core_type = #tpu.core_type<tc>, window_params = [{transform_indices = @transform_0, window_bounds = array<i64: 16, 32>}, {pipeline_mode = #tpu.pipeline_mode<synchronous>, transform_indices = @transform_1, window_bounds = array<i64: 32, 1024>}, {pipeline_mode = #tpu.pipeline_mode<synchronous>, transform_indices = @transform_2, window_bounds = array<i64: 1, 1024>}, {pipeline_mode = #tpu.pipeline_mode<synchronous>, transform_indices = @transform_3, window_bounds = array<i64: 1024, 128>}, {pipeline_mode = #tpu.pipeline_mode<synchronous>, transform_indices = @transform_4, window_bounds = array<i64: 1, 128>}, {transform_indices = @transform_5, window_bounds = array<i64: 16, 128>}]} {
    %c0 = arith.constant 0 : index
    %c0_0 = arith.constant 0 : index
    %0 = vector.load %arg1[%c0, %c0_0] : memref<16x32xbf16, #tpu.memory_space<vmem>>, vector<16x32xbf16>
    %c0_1 = arith.constant 0 : index
    %c0_2 = arith.constant 0 : index
    %1 = vector.load %arg2[%c0_1, %c0_2] : memref<32x1024xbf16, #tpu.memory_space<vmem>>, vector<32x1024xbf16>
    %cst = arith.constant dense<0.000000e+00> : vector<16x1024xf32>
    %2 = tpu.matmul %0, %1, %cst {dimension_numbers = #tpu.dot_dimension_numbers<[1], [0], [0], [1], [0, 0, 1, 1], [], []>} : vector<16x32xbf16>, vector<32x1024xbf16>, vector<16x1024xf32> -> vector<16x1024xf32>
    %c0_3 = arith.constant 0 : index
    %c0_4 = arith.constant 0 : index
    %3 = vector.load %arg3[%c0_3, %c0_4] : memref<1x1024xf32, #tpu.memory_space<vmem>>, vector<1x1024xf32>
    %4 = vector.broadcast %3 : vector<1x1024xf32> to vector<16x1024xf32>
    %5 = arith.addf %2, %4 : vector<16x1024xf32>
    %cst_5 = arith.constant 0.000000e+00 : f32
    %6 = vector.broadcast %cst_5 : f32 to vector<16x1024xf32>
    %7 = arith.maximumf %5, %6 : vector<16x1024xf32>
    %8 = arith.truncf %7 : vector<16x1024xf32> to vector<16x1024xbf16>
    %c0_6 = arith.constant 0 : index
    %c0_7 = arith.constant 0 : index
    %9 = vector.load %arg4[%c0_6, %c0_7] : memref<1024x128xbf16, #tpu.memory_space<vmem>>, vector<1024x128xbf16>
    %cst_8 = arith.constant dense<0.000000e+00> : vector<16x128xf32>
    %10 = tpu.matmul %8, %9, %cst_8 {dimension_numbers = #tpu.dot_dimension_numbers<[1], [0], [0], [1], [0, 0, 1, 1], [], []>} : vector<16x1024xbf16>, vector<1024x128xbf16>, vector<16x128xf32> -> vector<16x128xf32>
    %c0_9 = arith.constant 0 : index
    %c0_10 = arith.constant 0 : index
    %11 = vector.load %arg5[%c0_9, %c0_10] : memref<1x128xf32, #tpu.memory_space<vmem>>, vector<1x128xf32>
    %12 = vector.broadcast %11 : vector<1x128xf32> to vector<16x128xf32>
    %13 = arith.addf %10, %12 : vector<16x128xf32>
    %c0_11 = arith.constant 0 : index
    %c0_12 = arith.constant 0 : index
    %14 = vector.load %arg6[%c0_11, %c0_12] : memref<16x128xf32, #tpu.memory_space<vmem>>, vector<16x128xf32>
    tpu.vector_store %arg6[%c0_11, %c0_12], %13 {strides = array<i32>} : memref<16x128xf32, #tpu.memory_space<vmem>>, vector<16x128xf32>,
    return
  }
  func.func @transform_0(%arg0: i32) -> (i32, i32) {
    %c0_i32 = arith.constant 0 : i32
    %c0_i32_0 = arith.constant 0 : i32
    return %arg0, %c0_i32 : i32, i32
  }
  func.func @transform_1(%arg0: i32) -> (i32, i32) {
    %c0_i32 = arith.constant 0 : i32
    %c0_i32_0 = arith.constant 0 : i32
    %c0_i32_1 = arith.constant 0 : i32
    return %c0_i32, %c0_i32_0 : i32, i32
  }
  func.func @transform_2(%arg0: i32) -> (i32, i32) {
    %c0_i32 = arith.constant 0 : i32
    %c0_i32_0 = arith.constant 0 : i32
    %c0_i32_1 = arith.constant 0 : i32
    return %c0_i32, %c0_i32_0 : i32, i32
  }
  func.func @transform_3(%arg0: i32) -> (i32, i32) {
    %c0_i32 = arith.constant 0 : i32
    %c0_i32_0 = arith.constant 0 : i32
    %c0_i32_1 = arith.constant 0 : i32
    return %c0_i32, %c0_i32_0 : i32, i32
  }
  func.func @transform_4(%arg0: i32) -> (i32, i32) {
    %c0_i32 = arith.constant 0 : i32
    %c0_i32_0 = arith.constant 0 : i32
    %c0_i32_1 = arith.constant 0 : i32
    return %c0_i32, %c0_i32_0 : i32, i32
  }
  func.func @transform_5(%arg0: i32) -> (i32, i32) {
    %c0_i32 = arith.constant 0 : i32
    %c0_i32_0 = arith.constant 0 : i32
    return %arg0, %c0_i32 : i32, i32
  }
}

</mosaic_0001>

<bundles_post_ra>
// kernel: mlp_forward.1
= control target key start
LH: loop header
LB: loop body
LE: loop exit
PB: predicated region body
PF: predicated region fallthrough
CT: control target
= control target key end

     0   :  { %10 = vsyncpa [#allocation3], 0  ;;  %s1507_s0 = inlined_call_operand.vmem [shape: bf16[16,32], index: 0, kind: input, shape index: {}]   ;;  %s1508_s1 = inlined_call_operand.hbm [shape: bf16[32,1024], index: 1, kind: input, shape index: {}]   ;;  %s1509_s2 = inlined_call_operand.vmem [shape: f32[1,1024], index: 2, kind: input, shape index: {}]   ;;  %s1510_s3 = inlined_call_operand.hbm [shape: bf16[1024,128], index: 3, kind: input, shape index: {}]   ;;  %s1511_s4 = inlined_call_operand.vmem [shape: f32[1,128], index: 4, kind: input, shape index: {}]   ;;  %s1512_s5 = inlined_call_operand.vmem [shape: f32[16,128], index: 5, kind: output, shape index: {}]  }
   0x1   :  { %s18_s20 = sshll.u32 %s1508_s1, 4  ;;  %s19_s20 = int_to_ptr.hbm [resolvable:$true] %s18_s20 }
   0x2   :  { %11 = vsyncpa [#allocation5], 0  ;;  %s1422_s21 = smov [#allocation2]   ;;  %s33_s25 = sshll.u32 %s1510_s3, 4  ;;  %s34_s25 = int_to_ptr.hbm [resolvable:$true] %s33_s25 }
   0x3   :  { %s20_s22 = sshll.u32 %s1422_s21, 4  ;;  %s1423_s26 = smov 512   ;;  %s21_s22 = int_to_ptr.vmem [resolvable:$true] %s20_s22 }
   0x4   :  { %s1424_s27 = smov 32   ;;  %s1425_s28 = smov [#allocation4]  }
   0x5   :  { %26 = dma.hbm_to_vmem [thread:$0]  %s19_s20, 2048, %s21_s22, [#allocation3], %s1423_s26, %s1423_s26, %s1424_s27  }
   0x6   :  { %s35_s29 = sshll.u32 %s1425_s28, 4  ;;  %s1426_s30 = smov 64   ;;  %s36_s29 = int_to_ptr.vmem [resolvable:$true] %s35_s29 }
   0x7   :  { %s1427_s6 = smov 4  }
   0x8   :  { %41 = dma.hbm_to_vmem [thread:$0]  %s34_s25, 8192, %s36_s29, [#allocation5], %s1426_s30, %s1426_s30, %s1427_s6  }
   0x9   :  { %1418 = dma.done.wait [#allocation3], 2048  }
   0xa   :  { %1419 = vsyncadd [#allocation3], 4294965248 }
   0xb   :  { %1420 = dma.done.wait [#allocation5], 8192  }
   0xc   :  { %1421 = vsyncadd [#allocation5], 4294959104  ;;  %v988_v0 = vld [vmem:[#allocation2 + $0x40] sm:$0xf]  ;;  %v1291_v2 = vld [vmem:[#allocation2 + $0x44] sm:$0xf] }
   0xd   :  { %v1295_v1 = vld [vmem:[#allocation2 + $0x5c] sm:$0xf0]  ;;  %v990_v4 = vld [vmem:[#allocation2 + $0x60] sm:$0xf0]  ;;  %v996_v5 = vld [vmem:[#allocation2 + $0x48] sm:$0xf] }
   0xe   :  { %v989_v3 = vor.u32 %v1295_v1, %v988_v0  ;;  %v1296_v6 = vld [vmem:[#allocation2 + $0x64] sm:$0xf0]  ;;  %v993_v7 = vor.u32 %v1291_v2, %v990_v4  ;;  %v1292_v9 = vld [vmem:[#allocation2 + $0x4c] sm:$0xf]  ;;  %v956_v11 = vld [vmem:[#allocation2] sm:$0xf] }
   0xf   :  { %v997_v8 = vor.u32 %v1296_v6, %v996_v5  ;;  %v998_v10 = vld [vmem:[#allocation2 + $0x68] sm:$0xf0]  ;;  %v1287_v13 = vld [vmem:[#allocation2 + $0x1c] sm:$0xf0]  ;;  %v1283_v14 = vld [vmem:[#allocation2 + $0x4] sm:$0xf] }
  0x10   :  { %184 = vmatpush.bf16.msra.mxu0 %v989_v3  ;;  %v1001_v12 = vor.u32 %v1292_v9, %v998_v10  ;;  %v958_v15 = vld [vmem:[#allocation2 + $0x20] sm:$0xf0]  ;;  %198 = vmatpush.bf16.msra.mxu1 %v993_v7  ;;  %v957_v16 = vor.u32 %v1287_v13, %v956_v11  ;;  %v964_v18 = vld [vmem:[#allocation2 + $0x8] sm:$0xf]  ;;  %v1284_v20 = vld [vmem:[#allocation2 + $0xc] sm:$0xf] }
  0x11   :  { %212 = vmatpush.bf16.msra.mxu2 %v997_v8  ;;  %v961_v17 = vor.u32 %v1283_v14, %v958_v15  ;;  %v1288_v19 = vld [vmem:[#allocation2 + $0x24] sm:$0xf0]  ;;  %v966_v22 = vld [vmem:[#allocation2 + $0x28] sm:$0xf0]  ;;  %v1467_v23 = vld [vmem:[%s1507_s0] sm:$0xff]  ;;  %vm174_vm0 = vcmask 261120  }
  0x12   :  { %226 = vmatpush.bf16.msra.mxu3 %v1001_v12  ;;  %v965_v21 = vor.u32 %v1288_v19, %v964_v18  ;;  %v1012_v24 = vld [vmem:[#allocation2 + $0x58] sm:$0xf]  ;;  %v969_v25 = vor.u32 %v1284_v20, %v966_v22  ;;  %v1294_v27 = vld [vmem:[#allocation2 + $0x5c] sm:$0xf]  ;;  %v1004_v31 = vld [vmem:[#allocation2 + $0x50] sm:$0xf] }
  0x13   :  { %v1298_v26 = vld [vmem:[#allocation2 + $0x74] sm:$0xf0]  ;;  %v1014_v28 = vld [vmem:[#allocation2 + $0x78] sm:$0xf0]  ;;  %v1297_v32 = vld [vmem:[#allocation2 + $0x6c] sm:$0xf0] }
  0x14   :  { %185 = vmatpush.bf16.msra.mxu0 %v957_v16  ;;  %v1013_v29 = vor.u32 %v1298_v26, %v1012_v24  ;;  %v1017_v30 = vor.u32 %v1294_v27, %v1014_v28  ;;  %v980_v33 = vld [vmem:[#allocation2 + $0x18] sm:$0xf]  ;;  %199 = vmatpush.bf16.msra.mxu1 %v961_v17  ;;  %v1005_v34 = vor.u32 %v1297_v32, %v1004_v31  ;;  %v1293_v36 = vld [vmem:[#allocation2 + $0x54] sm:$0xf]  ;;  %v1286_v40 = vld [vmem:[#allocation2 + $0x1c] sm:$0xf] }
  0x15   :  { %213 = vmatpush.bf16.msra.mxu2 %v965_v21  ;;  %v1290_v35 = vld [vmem:[#allocation2 + $0x34] sm:$0xf0]  ;;  %v1006_v37 = vld [vmem:[#allocation2 + $0x70] sm:$0xf0]  ;;  %v982_v41 = vld [vmem:[#allocation2 + $0x38] sm:$0xf0] }
  0x16   :  { %227 = vmatpush.bf16.msra.mxu3 %v969_v25  ;;  %v981_v38 = vor.u32 %v1290_v35, %v980_v33  ;;  %v1009_v39 = vor.u32 %v1293_v36, %v1006_v37  ;;  %v972_v42 = vld [vmem:[#allocation2 + $0x10] sm:$0xf]  ;;  %v985_v43 = vor.u32 %v1286_v40, %v982_v41  ;;  %v1285_v45 = vld [vmem:[#allocation2 + $0x14] sm:$0xf]  ;;  %v1322_v48 = vld [vmem:[#allocation4 + $0xb8] sm:$0xff] }
  0x17   :  { %1018 = vmatmul.msk.bf16.vlgmr.msra.gmra.mxu0 %vm174_vm0, %v1467_v23  ;;  %v1289_v44 = vld [vmem:[#allocation2 + $0x2c] sm:$0xf0]  ;;  %v974_v46 = vld [vmem:[#allocation2 + $0x30] sm:$0xf0]  ;;  %1019 = vmatmul.msk.bf16.vlgmr.msra.gmra.mxu1 %vm174_vm0, %v1467_v23  ;;  %v1330_v49 = vld [vmem:[#allocation4 + $0xf8] sm:$0xff] }
  0x18   :  { %1020 = vmatmul.msk.bf16.vlgmr.msra.gmra.mxu2 %vm174_vm0, %v1467_v23  ;;  %240 = vmatpush.bf16.msrb.mxu0 %v1005_v34  ;;  %v973_v47 = vor.u32 %v1289_v44, %v972_v42  ;;  %v977_v50 = vor.u32 %v1285_v45, %v974_v46  ;;  %v1306_v51 = vld [vmem:[#allocation4 + $0x38] sm:$0xff]  ;;  %v1321_v53 = vld [vmem:[#allocation4 + $0xb0] sm:$0xff]  ;;  %v1320_v57 = vld [vmem:[#allocation4 + $0xa8] sm:$0xff] }
  0x19   :  { %268 = vmatpush.bf16.msrb.mxu2 %v1013_v29  ;;  %1021 = vmatmul.msk.bf16.vlgmr.msra.gmra.mxu3 %vm174_vm0, %v1467_v23  ;;  %v1314_v52 = vld [vmem:[#allocation4 + $0x78] sm:$0xff]  ;;  %v1329_v54 = vld [vmem:[#allocation4 + $0xf0] sm:$0xff]  ;;  %v1328_v58 = vld [vmem:[#allocation4 + $0xe8] sm:$0xff] }
  0x1a   :  { %282 = vmatpush.bf16.msrb.mxu3 %v1017_v30  ;;  %254 = vmatpush.bf16.msrb.mxu1 %v1009_v39  ;;  %v1305_v55 = vld [vmem:[#allocation4 + $0x30] sm:$0xff]  ;;  %v1304_v59 = vld [vmem:[#allocation4 + $0x28] sm:$0xff]  ;;  %v1319_v61 = vld [vmem:[#allocation4 + $0xa0] sm:$0xff] }
  0x1b   :  { %v1313_v56 = vld [vmem:[#allocation4 + $0x70] sm:$0xff]  ;;  %v1312_v60 = vld [vmem:[#allocation4 + $0x68] sm:$0xff]  ;;  %v1303_v62 = vld [vmem:[#allocation4 + $0x20] sm:$0xff] }
  0x1c   :  { %241 = vmatpush.bf16.msrb.mxu0 %v973_v47  ;;  %v1327_v63 = vld [vmem:[#allocation4 + $0xe0] sm:$0xff]  ;;  %v1318_v1 = vld [vmem:[#allocation4 + $0x98] sm:$0xff]  ;;  %v1317_v5 = vld [vmem:[#allocation4 + $0x90] sm:$0xff] }
  0x1d   :  { %269 = vmatpush.bf16.msrb.mxu2 %v981_v38  ;;  %v1311_v0 = vld [vmem:[#allocation4 + $0x60] sm:$0xff]  ;;  %v1302_v2 = vld [vmem:[#allocation4 + $0x18] sm:$0xff]  ;;  %v1301_v6 = vld [vmem:[#allocation4 + $0x10] sm:$0xff] }
  0x1e   :  { %283 = vmatpush.bf16.msrb.mxu3 %v985_v43  ;;  %255 = vmatpush.bf16.msrb.mxu1 %v977_v50  ;;  %v1326_v3 = vld [vmem:[#allocation4 + $0xd8] sm:$0xff]  ;;  %v1325_v7 = vld [vmem:[#allocation4 + $0xd0] sm:$0xff]  ;;  %v1300_v9 = vld [vmem:[#allocation4 + $0x8] sm:$0xff] }
  0x1f   :  { %v1310_v4 = vld [vmem:[#allocation4 + $0x58] sm:$0xff]  ;;  %v1309_v8 = vld [vmem:[#allocation4 + $0x50] sm:$0xff]  ;;  %v1308_v10 = vld [vmem:[#allocation4 + $0x48] sm:$0xff] }
  0x20   :  { %830 = vmatpush.bf16.msra.mxu0 %v1306_v51  ;;  %v1299_v11 = vld [vmem:[#allocation4] sm:$0xff]  ;;  %v1338_v13 = vld [vmem:[#allocation4 + $0x138] sm:$0xff]  ;;  %v1316_v15 = vld [vmem:[#allocation4 + $0x88] sm:$0xff] }
  0x21   :  { %858 = vmatpush.bf16.msra.mxu2 %v1322_v48  ;;  %v1307_v12 = vld [vmem:[#allocation4 + $0x40] sm:$0xff]  ;;  %v1346_v14 = vld [vmem:[#allocation4 + $0x178] sm:$0xff]  ;;  %v1324_v16 = vld [vmem:[#allocation4 + $0xc8] sm:$0xff] }
  0x22   :  { %872 = vmatpush.bf16.msra.mxu3 %v1330_v49  ;;  %844 = vmatpush.bf16.msra.mxu1 %v1314_v52  ;;  %v1337_v17 = vld [vmem:[#allocation4 + $0x130] sm:$0xff]  ;;  %v1315_v19 = vld [vmem:[#allocation4 + $0x80] sm:$0xff]  ;;  %v1354_v21 = vld [vmem:[#allocation4 + $0x1b8] sm:$0xff] }
  0x23   :  { %v1345_v18 = vld [vmem:[#allocation4 + $0x170] sm:$0xff]  ;;  %v1323_v20 = vld [vmem:[#allocation4 + $0xc0] sm:$0xff]  ;;  %v1362_v22 = vld [vmem:[#allocation4 + $0x1f8] sm:$0xff] }
  0x24   :  { %831 = vmatpush.bf16.msra.mxu0 %v1305_v55  ;;  %v1344_v24 = vld [vmem:[#allocation4 + $0x168] sm:$0xff]  ;;  %v1353_v25 = vld [vmem:[#allocation4 + $0x1b0] sm:$0xff]  ;;  %v1335_v27 = vld [vmem:[#allocation4 + $0x120] sm:$0xff] }
  0x25   :  { %859 = vmatpush.bf16.msra.mxu2 %v1321_v53  ;;  %v1361_v26 = vld [vmem:[#allocation4 + $0x1f0] sm:$0xff]  ;;  %v1343_v28 = vld [vmem:[#allocation4 + $0x160] sm:$0xff]  ;;  %v1352_v29 = vld [vmem:[#allocation4 + $0x1a8] sm:$0xff] }
  0x26   :  { %873 = vmatpush.bf16.msra.mxu3 %v1329_v54  ;;  %845 = vmatpush.bf16.msra.mxu1 %v1313_v56  ;;  %v1360_v30 = vld [vmem:[#allocation4 + $0x1e8] sm:$0xff]  ;;  %v1334_v31 = vld [vmem:[#allocation4 + $0x118] sm:$0xff]  ;;  %v1351_v33 = vld [vmem:[#allocation4 + $0x1a0] sm:$0xff] }
  0x27   :  { %1022 = vmatmul.msk.bf16.vlgmr.msrb.gmra.mxu0 %vm174_vm0, %v1467_v23  ;;  %1023 = vmatmul.msk.bf16.vlgmr.msrb.gmra.mxu1 %vm174_vm0, %v1467_v23  ;;  %v1342_v32 = vld [vmem:[#allocation4 + $0x158] sm:$0xff]  ;;  %v1359_v34 = vld [vmem:[#allocation4 + $0x1e0] sm:$0xff]  ;;  %v1333_v35 = vld [vmem:[#allocation4 + $0x110] sm:$0xff] }
  0x28   :  { %832 = vmatpush.bf16.msra.mxu0 %v1304_v59  ;;  %1024 = vmatmul.msk.bf16.vlgmr.msrb.gmra.mxu2 %vm174_vm0, %v1467_v23  ;;  %v1341_v36 = vld [vmem:[#allocation4 + $0x150] sm:$0xff]  ;;  %v1350_v37 = vld [vmem:[#allocation4 + $0x198] sm:$0xff]  ;;  %v1332_v39 = vld [vmem:[#allocation4 + $0x108] sm:$0xff] }
  0x29   :  { %860 = vmatpush.bf16.msra.mxu2 %v1320_v57  ;;  %1025 = vmatmul.msk.bf16.vlgmr.msrb.gmra.mxu3 %vm174_vm0, %v1467_v23  ;;  %v1336_v23 = vld [vmem:[#allocation4 + $0x128] sm:$0xff]  ;;  %v1358_v38 = vld [vmem:[#allocation4 + $0x1d8] sm:$0xff]  ;;  %v1349_v41 = vld [vmem:[#allocation4 + $0x190] sm:$0xff] }
  0x2a   :  { %874 = vmatpush.bf16.msra.mxu3 %v1328_v58  ;;  %846 = vmatpush.bf16.msra.mxu1 %v1312_v60  ;;  %v1340_v40 = vld [vmem:[#allocation4 + $0x148] sm:$0xff]  ;;  %v1357_v42 = vld [vmem:[#allocation4 + $0x1d0] sm:$0xff]  ;;  %v1331_v43 = vld [vmem:[#allocation4 + $0x100] sm:$0xff] }
  0x2b   :  { %v1339_v44 = vld [vmem:[#allocation4 + $0x140] sm:$0xff]  ;;  %v1348_v45 = vld [vmem:[#allocation4 + $0x188] sm:$0xff] }
  0x2c   :  { %833 = vmatpush.bf16.msra.mxu0 %v1303_v62  ;;  %v1356_v46 = vld [vmem:[#allocation4 + $0x1c8] sm:$0xff]  ;;  %v1488_v47 = vld [vmem:[%s1509_s2] sm:$0xff] }
  0x2d   :  { %861 = vmatpush.bf16.msra.mxu2 %v1319_v61  ;;  %v73_v49 = vperm.slane %v1488_v47, 0  ;;  %v74_v51 = vperm.slane %v1488_v47, 1  ;;  %v1347_v52 = vld [vmem:[#allocation4 + $0x180] sm:$0xff] }
  0x2e   :  { %875 = vmatpush.bf16.msra.mxu3 %v1327_v63  ;;  %847 = vmatpush.bf16.msra.mxu1 %v1311_v0  ;;  %v1355_v53 = vld [vmem:[#allocation4 + $0x1c0] sm:$0xff]  ;;  %v75_v63 = vperm.slane %v1488_v47, 2 }
  0x30   :  { %834 = vmatpush.bf16.msra.mxu0 %v1302_v2 }
  0x31   :  { %862 = vmatpush.bf16.msra.mxu2 %v1318_v1  ;;  %v76_v1 = vperm.slane %v1488_v47, 3 }
  0x32   :  { %876 = vmatpush.bf16.msra.mxu3 %v1326_v3  ;;  %848 = vmatpush.bf16.msra.mxu1 %v1310_v4 }
  0x34   :  { %835 = vmatpush.bf16.msra.mxu0 %v1301_v6 }
  0x35   :  { %863 = vmatpush.bf16.msra.mxu2 %v1317_v5 }
  0x36   :  { %877 = vmatpush.bf16.msra.mxu3 %v1325_v7  ;;  %849 = vmatpush.bf16.msra.mxu1 %v1309_v8 }
  0x38   :  { %836 = vmatpush.bf16.msra.mxu0 %v1300_v9 }
  0x39   :  { %864 = vmatpush.bf16.msra.mxu2 %v1316_v15 }
  0x3a   :  { %850 = vmatpush.bf16.msra.mxu1 %v1308_v10  ;;  %878 = vmatpush.bf16.msra.mxu3 %v1324_v16 }
  0x3c   :  { %837 = vmatpush.bf16.msra.mxu0 %v1299_v11 }
  0x3d   :  { %865 = vmatpush.bf16.msra.mxu2 %v1315_v19 }
  0x3e   :  { %851 = vmatpush.bf16.msra.mxu1 %v1307_v12  ;;  %879 = vmatpush.bf16.msra.mxu3 %v1323_v20 }
  0x40   :  { %886 = vmatpush.bf16.msrb.mxu0 %v1338_v13  ;;  %v77_v13 = vperm.slane %v1488_v47, 4 }
  0x41   :  { %914 = vmatpush.bf16.msrb.mxu2 %v1354_v21 }
  0x42   :  { %900 = vmatpush.bf16.msrb.mxu1 %v1346_v14  ;;  %928 = vmatpush.bf16.msrb.mxu3 %v1362_v22 }
  0x44   :  { %887 = vmatpush.bf16.msrb.mxu0 %v1337_v17  ;;  %v78_v17 = vperm.slane %v1488_v47, 5 }
  0x45   :  { %915 = vmatpush.bf16.msrb.mxu2 %v1353_v25 }
  0x46   :  { %901 = vmatpush.bf16.msrb.mxu1 %v1345_v18  ;;  %929 = vmatpush.bf16.msrb.mxu3 %v1361_v26 }
  0x48   :  { %888 = vmatpush.bf16.msrb.mxu0 %v1336_v23 }
  0x49   :  { %916 = vmatpush.bf16.msrb.mxu2 %v1352_v29 }
  0x4a   :  { %902 = vmatpush.bf16.msrb.mxu1 %v1344_v24  ;;  %930 = vmatpush.bf16.msrb.mxu3 %v1360_v30 }
  0x4c   :  { %889 = vmatpush.bf16.msrb.mxu0 %v1335_v27 }
  0x4d   :  { %917 = vmatpush.bf16.msrb.mxu2 %v1351_v33  ;;  %v80_v33 = vperm.slane %v1488_v47, 7 }
  0x4e   :  { %903 = vmatpush.bf16.msrb.mxu1 %v1343_v28  ;;  %931 = vmatpush.bf16.msrb.mxu3 %v1359_v34 }
  0x50   :  { %890 = vmatpush.bf16.msrb.mxu0 %v1334_v31  ;;  %v79_v31 = vperm.slane %v1488_v47, 6 }
  0x51   :  { %918 = vmatpush.bf16.msrb.mxu2 %v1350_v37 }
  0x52   :  { %904 = vmatpush.bf16.msrb.mxu1 %v1342_v32  ;;  %932 = vmatpush.bf16.msrb.mxu3 %v1358_v38 }
  0x54   :  { %891 = vmatpush.bf16.msrb.mxu0 %v1333_v35 }
  0x55   :  { %919 = vmatpush.bf16.msrb.mxu2 %v1349_v41 }
  0x56   :  { %905 = vmatpush.bf16.msrb.mxu1 %v1341_v36  ;;  %933 = vmatpush.bf16.msrb.mxu3 %v1357_v42 }
  0x58   :  { %892 = vmatpush.bf16.msrb.mxu0 %v1332_v39 }
  0x59   :  { %920 = vmatpush.bf16.msrb.mxu2 %v1348_v45 }
  0x5a   :  { %906 = vmatpush.bf16.msrb.mxu1 %v1340_v40  ;;  %934 = vmatpush.bf16.msrb.mxu3 %v1356_v46 }
  0x5c   :  { %893 = vmatpush.bf16.msrb.mxu0 %v1331_v43 }
  0x5d   :  { %921 = vmatpush.bf16.msrb.mxu2 %v1347_v52  ;;  %v1369_v52 = vld [vmem:[%s1511_s4] ss:$0 sm:$0xff] }
  0x5e   :  { %907 = vmatpush.bf16.msrb.mxu1 %v1339_v44  ;;  %935 = vmatpush.bf16.msrb.mxu3 %v1355_v53 }
  0x94   :  { %v187_v48 = vpop.f32.mrf.mxu0  ;;  %v201_v50 = vpop.f32.mrf.mxu1 }
  0x95   :  { %v188_v54 = vadd.f32 %v187_v48, %v73_v49  ;;  %v202_v55 = vadd.f32 %v201_v50, %v74_v51 }
  0x97   :  { %v290_v59 = vmax.f32 %v188_v54, 0.0  ;;  %v291_v62 = vmax.f32 %v202_v55, 0.0 }
  0x9b   :  { %v215_v56 = vpop.f32.mrf.mxu2 }
  0x9c   :  { %v229_v57 = vpop.f32.mrf.mxu3  ;;  %v189_v58 = vpop.f32.mrf.mxu0  ;;  %v216_v5 = vadd.f32 %v215_v56, %v75_v63 }
  0x9d   :  { %v190_v60 = vadd.f32 %v189_v58, %v73_v49  ;;  %v203_v61 = vpop.f32.mrf.mxu1  ;;  %v230_v7 = vadd.f32 %v229_v57, %v76_v1 }
  0x9e   :  { %v204_v0 = vadd.f32 %v203_v61, %v74_v51  ;;  %v292_v15 = vmax.f32 %v216_v5, 0.0 }
  0x9f   :  { %v298_v2 = vmax.f32 %v190_v60, 0.0  ;;  %v293_v18 = vmax.f32 %v230_v7, 0.0 }
  0xa0   :  { %v299_v3 = vmax.f32 %v204_v0, 0.0 }
  0xa1   :  { %v306_v4 = vpack.c.bf16 %v298_v2, %v290_v59 }
  0xa2   :  { %v307_v6 = vpack.c.bf16 %v299_v3, %v291_v62 }
  0xa3   :  { %v217_v8 = vpop.f32.mrf.mxu2  ;;  %838 = vmatmul.bf16.vlgmr.msra.gmra.mxu0 %v306_v4 }
  0xa4   :  { %v218_v9 = vadd.f32 %v217_v8, %v75_v63  ;;  %v231_v10 = vpop.f32.mrf.mxu3  ;;  %852 = vmatmul.bf16.vlgmr.msra.gmra.mxu1 %v307_v6  ;;  %v243_v11 = vpop.f32.mrf.mxu0 }
  0xa5   :  { %v232_v12 = vadd.f32 %v231_v10, %v76_v1  ;;  %v257_v14 = vpop.f32.mrf.mxu1  ;;  %v244_v22 = vadd.f32 %v243_v11, %v77_v13 }
  0xa6   :  { %v300_v16 = vmax.f32 %v218_v9, 0.0  ;;  %v258_v23 = vadd.f32 %v257_v14, %v78_v17 }
  0xa7   :  { %v301_v19 = vmax.f32 %v232_v12, 0.0  ;;  %v294_v27 = vmax.f32 %v244_v22, 0.0 }
  0xa8   :  { %v308_v20 = vpack.c.bf16 %v300_v16, %v292_v15  ;;  %v295_v30 = vmax.f32 %v258_v23, 0.0 }
  0xa9   :  { %v309_v21 = vpack.c.bf16 %v301_v19, %v293_v18 }
  0xaa   :  { %866 = vmatmul.bf16.vlgmr.msra.gmra.mxu2 %v308_v20 }
  0xab   :  { %880 = vmatmul.bf16.vlgmr.msra.gmra.mxu3 %v309_v21  ;;  %v271_v24 = vpop.f32.mrf.mxu2 }
  0xac   :  { %v285_v25 = vpop.f32.mrf.mxu3  ;;  %v245_v26 = vpop.f32.mrf.mxu0  ;;  %v272_v37 = vadd.f32 %v271_v24, %v79_v31 }
  0xad   :  { %v246_v28 = vadd.f32 %v245_v26, %v77_v13  ;;  %v259_v29 = vpop.f32.mrf.mxu1  ;;  %v286_v39 = vadd.f32 %v285_v25, %v80_v33 }
  0xae   :  { %v260_v32 = vadd.f32 %v259_v29, %v78_v17  ;;  %v296_v44 = vmax.f32 %v272_v37, 0.0 }
  0xaf   :  { %v302_v34 = vmax.f32 %v246_v28, 0.0  ;;  %v297_v46 = vmax.f32 %v286_v39, 0.0 }
  0xb0   :  { %v303_v35 = vmax.f32 %v260_v32, 0.0 }
  0xb1   :  { %v310_v36 = vpack.c.bf16 %v302_v34, %v294_v27 }
  0xb2   :  { %v311_v38 = vpack.c.bf16 %v303_v35, %v295_v30 }
  0xb3   :  { %v273_v40 = vpop.f32.mrf.mxu2  ;;  %894 = vmatmul.bf16.vlgmr.msrb.gmra.mxu0 %v310_v36 }
  0xb4   :  { %v274_v41 = vadd.f32 %v273_v40, %v79_v31  ;;  %v287_v42 = vpop.f32.mrf.mxu3  ;;  %908 = vmatmul.bf16.vlgmr.msrb.gmra.mxu1 %v311_v38 }
  0xb5   :  { %v288_v43 = vadd.f32 %v287_v42, %v80_v33 }
  0xb6   :  { %v304_v45 = vmax.f32 %v274_v41, 0.0 }
  0xb7   :  { %v305_v48 = vmax.f32 %v288_v43, 0.0 }
  0xb8   :  { %v312_v49 = vpack.c.bf16 %v304_v45, %v296_v44 }
  0xb9   :  { %v313_v50 = vpack.c.bf16 %v305_v48, %v297_v46 }
  0xba   :  { %922 = vmatmul.bf16.vlgmr.msrb.gmra.mxu2 %v312_v49 }
  0xbb   :  { %936 = vmatmul.bf16.vlgmr.msrb.gmra.mxu3 %v313_v50 }
 0x120   :  { %v839_v47 = vpop.f32.mrf.mxu0 }
 0x121   :  { %v853_v51 = vpop.f32.mrf.mxu1  ;;  %v840_v54 = vadd.f32 %v1369_v52, %v839_v47 }
 0x123   :  { %v854_v56 = vadd.f32 %v853_v51, %v840_v54 }
 0x128   :  { %v841_v53 = vpop.f32.mrf.mxu0 }
 0x129   :  { %v855_v58 = vpop.f32.mrf.mxu1  ;;  %v842_v60 = vadd.f32 %v1369_v52, %v841_v53 }
 0x12b   :  { %v856_v0 = vadd.f32 %v855_v58, %v842_v60 }
 0x12d   :  { %v867_v55 = vpop.f32.mrf.mxu2 }
 0x12e   :  { %v881_v57 = vpop.f32.mrf.mxu3  ;;  %v868_v59 = vadd.f32 %v867_v55, %v854_v56 }
 0x130   :  { %v895_v61 = vpop.f32.mrf.mxu0  ;;  %v882_v62 = vadd.f32 %v881_v57, %v868_v59 }
 0x131   :  { %v909_v4 = vpop.f32.mrf.mxu1 }
 0x132   :  { %v896_v2 = vadd.f32 %v895_v61, %v882_v62 }
 0x134   :  { %v910_v5 = vadd.f32 %v909_v4, %v896_v2 }
 0x135   :  { %v869_v63 = vpop.f32.mrf.mxu2 }
 0x136   :  { %v883_v1 = vpop.f32.mrf.mxu3  ;;  %v870_v3 = vadd.f32 %v869_v63, %v856_v0 }
 0x138   :  { %v884_v6 = vadd.f32 %v883_v1, %v870_v3  ;;  %v897_v7 = vpop.f32.mrf.mxu0 }
 0x139   :  { %v911_v13 = vpop.f32.mrf.mxu1 }
 0x13a   :  { %v898_v11 = vadd.f32 %v897_v7, %v884_v6 }
 0x13c   :  { %v912_v14 = vadd.f32 %v911_v13, %v898_v11 }
 0x13d   :  { %v923_v8 = vpop.f32.mrf.mxu2 }
 0x13e   :  { %v924_v9 = vadd.f32 %v923_v8, %v910_v5  ;;  %v937_v10 = vpop.f32.mrf.mxu3 }
 0x140   :  { %v938_v12 = vadd.f32 %v937_v10, %v924_v9 }
 0x142   :  { %942 = vst [vmem:[%s1512_s5] sm:$0xff] %v938_v12 }
 0x145   :  { %v925_v15 = vpop.f32.mrf.mxu2 }
 0x146   :  { %v926_v16 = vadd.f32 %v925_v15, %v912_v14  ;;  %v939_v17 = vpop.f32.mrf.mxu3 }
 0x148   :  { %v940_v18 = vadd.f32 %v939_v17, %v926_v16 }
 0x14a   :  { %943 = vst [vmem:[%s1512_s5 + $0x8] sm:$0xff] %v940_v18 }
 0x14b   :  { %948 = vsyncpa [#allocation3], 1 }
 0x14c   :  { %949 = vsyncpa [#allocation5], 1 }

</bundles_post_ra>
